<compile_context>
chip_gen: v7x
topology: tpu7x:2x2x1
jax: 0.10.0
libtpu: 0.0.40
codegen_flags: <defaults>
</compile_context>

<pallas_src>
import functools

import jax
import jax.numpy as jnp
from jax.experimental import pallas as pl
from jax.experimental.pallas import tpu as pltpu

LANE = 128  # TPU lane width: padding target for hidden/output feature dims


def _round_up(x: int, m: int) -> int:
    return (x + m - 1) // m * m


def _cdiv(a: int, b: int) -> int:
    return (a + b - 1) // b


# ----------------------------- Pallas kernel ---------------------------------
def _decoder_kernel(*refs, depth: int, act_dtype):
    """Fused MLP: depth x (Linear -> tanh) + output Linear, lane-dense output.

    refs = (x_ref, w0, b0, ..., w_{depth-1}, b_{depth-1}, wo, bo, out_ref)
    Matmuls run on the MXU in the weights' dtype (bf16 by default) with f32
    accumulation; the bias add is f32; tanh runs in act_dtype.
    """
    x_ref = refs[0]
    out_ref = refs[-1]

    h = x_ref[...]
    for idx in range(depth):
        w_ref = refs[1 + 2 * idx]
        b_ref = refs[2 + 2 * idx]
        h = jnp.dot(h.astype(w_ref.dtype), w_ref[...],
                    preferred_element_type=jnp.float32) + b_ref[...]
        h = jnp.tanh(h.astype(act_dtype))
    wo_ref = refs[1 + 2 * depth]
    bo_ref = refs[2 + 2 * depth]
    y = jnp.dot(h.astype(wo_ref.dtype), wo_ref[...],
                preferred_element_type=jnp.float32) + bo_ref[...]
    out_ref[...] = y.astype(out_ref.dtype)


# ------------------------ one-time parameter preparation ----------------------
def prepare_decoder_params(params, *, hidden_features: int, depth: int,
                           num_classes: int, compute_dtype=jnp.bfloat16):
    """Cast + lane-pad weights/biases ONCE (cache the result; do not redo per call).

    Zero-padding is exact: padded hidden cols get 0 weight + 0 bias -> tanh(0)=0,
    and padded rows of the next layer's weight are zero; padded output cols are
    sliced off in the wrapper. Layer-0 fan_in stays at the true in_features so the
    x stream needs no lane padding.
    """
    hid_p = _round_up(hidden_features, LANE)
    out_dim = num_classes + hidden_features
    out_p = _round_up(out_dim, LANE)

    def pad2(a, rows, cols, dtype):
        a = jnp.asarray(a, dtype)
        if a.shape == (rows, cols):
            return a
        return jnp.zeros((rows, cols), dtype).at[:a.shape[0], :a.shape[1]].set(a)

    prepared = []
    for idx in range(depth):
        w = params[f"w{idx}"]
        rows = w.shape[0] if idx == 0 else hid_p  # keep true in_features for layer 0
        prepared.append(pad2(w, rows, hid_p, compute_dtype))
        prepared.append(pad2(params[f"b{idx}"], 1, hid_p, jnp.float32))
    prepared.append(pad2(params["wo"], hid_p, out_p, compute_dtype))
    prepared.append(pad2(params["bo"], 1, out_p, jnp.float32))
    return tuple(prepared)


# ------------------------------- wrapper --------------------------------------
@functools.partial(
    jax.jit,
    static_argnames=("num_classes", "hidden_features", "depth", "tile_m",
                     "act_dtype"),
)
def decoder_forward(x, prepared_params, *, num_classes: int, hidden_features: int,
                    depth: int = 3, tile_m: int = 1024, act_dtype=None):
    """Decoder forward via one fused Pallas kernel.

    x: [N, in_features] (pass bf16 to additionally halve the x DMA stream; the
       kernel casts to the weights' dtype in VMEM either way)
    prepared_params: output of prepare_decoder_params (tuple, kernel arg order)
    returns (structure [N, num_classes], embedding [N, hidden_features])
    """
    N, in_features = x.shape
    out_dim = num_classes + hidden_features
    hid_p = prepared_params[1].shape[-1]    # padded hidden width (from b0)
    out_p = prepared_params[-1].shape[-1]   # padded fused-output width (from bo)
    assert prepared_params[0].shape[0] == in_features, "w0 fan_in != x features"

    # Activation dtype: bf16 on v6e/v7x (native VPU/EUP bf16), f32 on v5e / f32 path.
    if act_dtype is None:
        if prepared_params[0].dtype == jnp.float32:
            act_dtype = jnp.float32
        else:
            try:
                kind = jax.devices()[0].device_kind.lower()
            except Exception:  # pragma: no cover - defensive
                kind = ""
            act_dtype = jnp.float32 if "v5" in kind else jnp.bfloat16

    # Row tiling: big tiles amortize per-grid-step overhead; for small N the grid
    # collapses to (1,). When N is large enough, guarantee >=2 'parallel' steps so
    # v7x's two TensorCores both get work.
    tm = _round_up(min(tile_m, _round_up(N, 8)), 8)
    if N > 256 and _cdiv(N, tm) < 2:
        tm = _round_up(_cdiv(N, 2), 8)
    grid_m = _cdiv(N, tm)  # partial final row tile handled by Pallas (no x row-pad)

    # Accurate VMEM budget: resident weights (counted double-buffered to be safe),
    # double-buffered x/out tiles, intermediate headroom; clamp below v7x's 64 MiB.
    w_bytes = sum(int(a.size) * a.dtype.itemsize for a in prepared_params)
    x_tile = tm * in_features * x.dtype.itemsize
    out_tile = tm * out_p * x.dtype.itemsize
    act_bytes = 4 * tm * hid_p * 4
    vmem_limit = int(min(
        max(2 * w_bytes + 2 * (x_tile + out_tile) + act_bytes + (4 << 20), 8 << 20),
        48 << 20))

    # x streams at its TRUE width: block last dim == full array dim (legal, no pad).
    in_specs = [pl.BlockSpec((tm, in_features), lambda i: (i, 0))]
    for arr in prepared_params:  # weights/biases fully resident across the grid
        in_specs.append(pl.BlockSpec(arr.shape, lambda i: (0, 0)))

    kernel = functools.partial(_decoder_kernel, depth=depth, act_dtype=act_dtype)

    out = pl.pallas_call(
        kernel,
        out_shape=jax.ShapeDtypeStruct((N, out_p), x.dtype),
        grid_spec=pltpu.PrefetchScalarGridSpec(
            num_scalar_prefetch=0,
            grid=(grid_m,),
            in_specs=in_specs,
            out_specs=pl.BlockSpec((tm, out_p), lambda i: (i, 0)),  # lane-dense slab
        ),
        compiler_params=pltpu.CompilerParams(
            dimension_semantics=("parallel",),
            vmem_limit_bytes=vmem_limit,
        ),
    )(x, *prepared_params)

    # split([num_classes, hidden_features], dim=-1) + strip lane padding.
    # (Kept in the wrapper so the kernel's stores stay lane-dense/unmasked;
    # downstream code that can consume the fused slab should slice lazily there.)
    structure = out[:, :num_classes]
    embedding = out[:, num_classes:out_dim]
    return structure, embedding


# ------------------------- deterministic param init ---------------------------
def init_decoder_params(key, in_features, hidden_features, depth, num_classes):
    dims_in = [in_features] + [hidden_features] * (depth - 1)
    params = {}
    keys = jax.random.split(key, depth + 1)
    for idx in range(depth):
        kw, kb = jax.random.split(keys[idx])
        scale = 1.0 / jnp.sqrt(dims_in[idx])
        params[f"w{idx}"] = jax.random.uniform(
            kw, (dims_in[idx], hidden_features), jnp.float32, -scale, scale)
        params[f"b{idx}"] = jax.random.uniform(
            kb, (1, hidden_features), jnp.float32, -scale, scale)
    kw, kb = jax.random.split(keys[depth])
    out_dim = num_classes + hidden_features
    scale = 1.0 / jnp.sqrt(hidden_features)
    params["wo"] = jax.random.uniform(
        kw, (hidden_features, out_dim), jnp.float32, -scale, scale)
    params["bo"] = jax.random.uniform(kb, (1, out_dim), jnp.float32, -scale, scale)
    return params


# ------------------------------ reference (JAX) --------------------------------
def decoder_forward_ref(x, params, *, num_classes, depth=3):
    h = x
    for idx in range(depth):
        h = jnp.tanh(h @ params[f"w{idx}"] + params[f"b{idx}"])
    out = h @ params["wo"] + params["bo"]
    return out[:, :num_classes], out[:, num_classes:]


# ---------------------------------- main ---------------------------------------
if __name__ == "__main__":
    IN_FEATURES = 32
    HIDDEN = 32
    DEPTH = 3
    NUM_CLASSES = 28
    N = 16  # number of "nodes" / rows in x

    key = jax.random.PRNGKey(0)
    kx, kp = jax.random.split(key)
    x = jax.random.normal(kx, (N, IN_FEATURES), jnp.float32)
    params = init_decoder_params(kp, IN_FEATURES, HIDDEN, DEPTH, NUM_CLASSES)

    ref_structure, ref_embedding = decoder_forward_ref(
        x, params, num_classes=NUM_CLASSES, depth=DEPTH)

    # --- f32 compute path: bit-for-bit-ish against the plain-JAX reference ------
    prep_f32 = prepare_decoder_params(
        params, hidden_features=HIDDEN, depth=DEPTH, num_classes=NUM_CLASSES,
        compute_dtype=jnp.float32)
    s32, e32 = decoder_forward(
        x, prep_f32, num_classes=NUM_CLASSES, hidden_features=HIDDEN, depth=DEPTH)
    jax.block_until_ready((s32, e32))
    assert s32.shape == (N, NUM_CLASSES) and e32.shape == (N, HIDDEN)
    assert jnp.allclose(s32, ref_structure, atol=1e-5, rtol=1e-5)
    assert jnp.allclose(e32, ref_embedding, atol=1e-5, rtol=1e-5)

    # --- default bf16 compute path (native MXU rate): loose tolerance -----------
    prep_bf16 = prepare_decoder_params(
        params, hidden_features=HIDDEN, depth=DEPTH, num_classes=NUM_CLASSES)
    sb, eb = decoder_forward(
        x, prep_bf16, num_classes=NUM_CLASSES, hidden_features=HIDDEN, depth=DEPTH)
    jax.block_until_ready((sb, eb))
    assert sb.shape == (N, NUM_CLASSES) and eb.shape == (N, HIDDEN)
    assert jnp.allclose(sb, ref_structure, atol=5e-2, rtol=5e-2)
    assert jnp.allclose(eb, ref_embedding, atol=5e-2, rtol=5e-2)

    # TODO(synk): Decoder.loss (graph-dependent Bernoulli/Categorical losses over
    # g.edges/g.ndata) is not part of forward() and is left to host-side JAX.
    print("KERNEL_OK")
</pallas_src>

<mosaic_0001>
module attributes {stable_mosaic.version = 11 : i64} {
  func.func @_decoder_kernel(%arg0: i32, %arg1: memref<16x32xf32, #tpu.memory_space<vmem>>, %arg2: memref<32x128xf32, #tpu.memory_space<vmem>>, %arg3: memref<1x128xf32, #tpu.memory_space<vmem>>, %arg4: memref<128x128xf32, #tpu.memory_space<vmem>>, %arg5: memref<1x128xf32, #tpu.memory_space<vmem>>, %arg6: memref<128x128xf32, #tpu.memory_space<vmem>>, %arg7: memref<1x128xf32, #tpu.memory_space<vmem>>, %arg8: memref<128x128xf32, #tpu.memory_space<vmem>>, %arg9: memref<1x128xf32, #tpu.memory_space<vmem>>, %arg10: memref<16x128xf32, #tpu.memory_space<vmem>>) attributes {dimension_semantics = [#tpu.dimension_semantics<parallel>], iteration_bounds = array<i64: 1>, scalar_prefetch = 0 : i64, scratch_operands = 0 : i64, tpu.core_type = #tpu.core_type<tc>, window_params = [{transform_indices = @transform_0, window_bounds = array<i64: 16, 32>}, {pipeline_mode = #tpu.pipeline_mode<synchronous>, transform_indices = @transform_1, window_bounds = array<i64: 32, 128>}, {pipeline_mode = #tpu.pipeline_mode<synchronous>, transform_indices = @transform_2, window_bounds = array<i64: 1, 128>}, {pipeline_mode = #tpu.pipeline_mode<synchronous>, transform_indices = @transform_3, window_bounds = array<i64: 128, 128>}, {pipeline_mode = #tpu.pipeline_mode<synchronous>, transform_indices = @transform_4, window_bounds = array<i64: 1, 128>}, {pipeline_mode = #tpu.pipeline_mode<synchronous>, transform_indices = @transform_5, window_bounds = array<i64: 128, 128>}, {pipeline_mode = #tpu.pipeline_mode<synchronous>, transform_indices = @transform_6, window_bounds = array<i64: 1, 128>}, {pipeline_mode = #tpu.pipeline_mode<synchronous>, transform_indices = @transform_7, window_bounds = array<i64: 128, 128>}, {pipeline_mode = #tpu.pipeline_mode<synchronous>, transform_indices = @transform_8, window_bounds = array<i64: 1, 128>}, {transform_indices = @transform_9, window_bounds = array<i64: 16, 128>}]} {
    %c0 = arith.constant 0 : index
    %c0_0 = arith.constant 0 : index
    %0 = vector.load %arg1[%c0, %c0_0] : memref<16x32xf32, #tpu.memory_space<vmem>>, vector<16x32xf32>
    %c0_1 = arith.constant 0 : index
    %c0_2 = arith.constant 0 : index
    %1 = vector.load %arg2[%c0_1, %c0_2] : memref<32x128xf32, #tpu.memory_space<vmem>>, vector<32x128xf32>
    %cst = arith.constant dense<0.000000e+00> : vector<16x128xf32>
    %2 = tpu.matmul %0, %1, %cst {dimension_numbers = #tpu.dot_dimension_numbers<[1], [0], [0], [1], [0, 0, 1, 1], [], []>} : vector<16x32xf32>, vector<32x128xf32>, vector<16x128xf32> -> vector<16x128xf32>
    %c0_3 = arith.constant 0 : index
    %c0_4 = arith.constant 0 : index
    %3 = vector.load %arg3[%c0_3, %c0_4] : memref<1x128xf32, #tpu.memory_space<vmem>>, vector<1x128xf32>
    %4 = vector.broadcast %3 : vector<1x128xf32> to vector<16x128xf32>
    %5 = arith.addf %2, %4 : vector<16x128xf32>
    %6 = math.tanh %5 : vector<16x128xf32>
    %c0_5 = arith.constant 0 : index
    %c0_6 = arith.constant 0 : index
    %7 = vector.load %arg4[%c0_5, %c0_6] : memref<128x128xf32, #tpu.memory_space<vmem>>, vector<128x128xf32>
    %cst_7 = arith.constant dense<0.000000e+00> : vector<16x128xf32>
    %8 = tpu.matmul %6, %7, %cst_7 {dimension_numbers = #tpu.dot_dimension_numbers<[1], [0], [0], [1], [0, 0, 1, 1], [], []>} : vector<16x128xf32>, vector<128x128xf32>, vector<16x128xf32> -> vector<16x128xf32>
    %c0_8 = arith.constant 0 : index
    %c0_9 = arith.constant 0 : index
    %9 = vector.load %arg5[%c0_8, %c0_9] : memref<1x128xf32, #tpu.memory_space<vmem>>, vector<1x128xf32>
    %10 = vector.broadcast %9 : vector<1x128xf32> to vector<16x128xf32>
    %11 = arith.addf %8, %10 : vector<16x128xf32>
    %12 = math.tanh %11 : vector<16x128xf32>
    %c0_10 = arith.constant 0 : index
    %c0_11 = arith.constant 0 : index
    %13 = vector.load %arg6[%c0_10, %c0_11] : memref<128x128xf32, #tpu.memory_space<vmem>>, vector<128x128xf32>
    %cst_12 = arith.constant dense<0.000000e+00> : vector<16x128xf32>
    %14 = tpu.matmul %12, %13, %cst_12 {dimension_numbers = #tpu.dot_dimension_numbers<[1], [0], [0], [1], [0, 0, 1, 1], [], []>} : vector<16x128xf32>, vector<128x128xf32>, vector<16x128xf32> -> vector<16x128xf32>
    %c0_13 = arith.constant 0 : index
    %c0_14 = arith.constant 0 : index
    %15 = vector.load %arg7[%c0_13, %c0_14] : memref<1x128xf32, #tpu.memory_space<vmem>>, vector<1x128xf32>
    %16 = vector.broadcast %15 : vector<1x128xf32> to vector<16x128xf32>
    %17 = arith.addf %14, %16 : vector<16x128xf32>
    %18 = math.tanh %17 : vector<16x128xf32>
    %c0_15 = arith.constant 0 : index
    %c0_16 = arith.constant 0 : index
    %19 = vector.load %arg8[%c0_15, %c0_16] : memref<128x128xf32, #tpu.memory_space<vmem>>, vector<128x128xf32>
    %cst_17 = arith.constant dense<0.000000e+00> : vector<16x128xf32>
    %20 = tpu.matmul %18, %19, %cst_17 {dimension_numbers = #tpu.dot_dimension_numbers<[1], [0], [0], [1], [0, 0, 1, 1], [], []>} : vector<16x128xf32>, vector<128x128xf32>, vector<16x128xf32> -> vector<16x128xf32>
    %c0_18 = arith.constant 0 : index
    %c0_19 = arith.constant 0 : index
    %21 = vector.load %arg9[%c0_18, %c0_19] : memref<1x128xf32, #tpu.memory_space<vmem>>, vector<1x128xf32>
    %22 = vector.broadcast %21 : vector<1x128xf32> to vector<16x128xf32>
    %23 = arith.addf %20, %22 : vector<16x128xf32>
    %c0_20 = arith.constant 0 : index
    %c0_21 = arith.constant 0 : index
    %24 = vector.load %arg10[%c0_20, %c0_21] : memref<16x128xf32, #tpu.memory_space<vmem>>, vector<16x128xf32>
    tpu.vector_store %arg10[%c0_20, %c0_21], %23 {strides = array<i32>} : memref<16x128xf32, #tpu.memory_space<vmem>>, vector<16x128xf32>,
    return
  }
  func.func @transform_0(%arg0: i32) -> (i32, i32) {
    %c0_i32 = arith.constant 0 : i32
    %c0_i32_0 = arith.constant 0 : i32
    return %arg0, %c0_i32 : i32, i32
  }
  func.func @transform_1(%arg0: i32) -> (i32, i32) {
    %c0_i32 = arith.constant 0 : i32
    %c0_i32_0 = arith.constant 0 : i32
    %c0_i32_1 = arith.constant 0 : i32
    return %c0_i32, %c0_i32_0 : i32, i32
  }
  func.func @transform_2(%arg0: i32) -> (i32, i32) {
    %c0_i32 = arith.constant 0 : i32
    %c0_i32_0 = arith.constant 0 : i32
    %c0_i32_1 = arith.constant 0 : i32
    return %c0_i32, %c0_i32_0 : i32, i32
  }
  func.func @transform_3(%arg0: i32) -> (i32, i32) {
    %c0_i32 = arith.constant 0 : i32
    %c0_i32_0 = arith.constant 0 : i32
    %c0_i32_1 = arith.constant 0 : i32
    return %c0_i32, %c0_i32_0 : i32, i32
  }
  func.func @transform_4(%arg0: i32) -> (i32, i32) {
    %c0_i32 = arith.constant 0 : i32
    %c0_i32_0 = arith.constant 0 : i32
    %c0_i32_1 = arith.constant 0 : i32
    return %c0_i32, %c0_i32_0 : i32, i32
  }
  func.func @transform_5(%arg0: i32) -> (i32, i32) {
    %c0_i32 = arith.constant 0 : i32
    %c0_i32_0 = arith.constant 0 : i32
    %c0_i32_1 = arith.constant 0 : i32
    return %c0_i32, %c0_i32_0 : i32, i32
  }
  func.func @transform_6(%arg0: i32) -> (i32, i32) {
    %c0_i32 = arith.constant 0 : i32
    %c0_i32_0 = arith.constant 0 : i32
    %c0_i32_1 = arith.constant 0 : i32
    return %c0_i32, %c0_i32_0 : i32, i32
  }
  func.func @transform_7(%arg0: i32) -> (i32, i32) {
    %c0_i32 = arith.constant 0 : i32
    %c0_i32_0 = arith.constant 0 : i32
    %c0_i32_1 = arith.constant 0 : i32
    return %c0_i32, %c0_i32_0 : i32, i32
  }
  func.func @transform_8(%arg0: i32) -> (i32, i32) {
    %c0_i32 = arith.constant 0 : i32
    %c0_i32_0 = arith.constant 0 : i32
    %c0_i32_1 = arith.constant 0 : i32
    return %c0_i32, %c0_i32_0 : i32, i32
  }
  func.func @transform_9(%arg0: i32) -> (i32, i32) {
    %c0_i32 = arith.constant 0 : i32
    %c0_i32_0 = arith.constant 0 : i32
    return %arg0, %c0_i32 : i32, i32
  }
}

</mosaic_0001>

<bundles_post_ra>
// kernel: decoder_forward.1
= control target key start
LH: loop header
LB: loop body
LE: loop exit
PB: predicated region body
PF: predicated region fallthrough
CT: control target
= control target key end

     0   :  { %14 = vsyncpa [#allocation3], 0  ;;  %s1091_s0 = inlined_call_operand.hbm [shape: f32[16,32], index: 0, kind: input, shape index: {}]   ;;  %s1092_s1 = inlined_call_operand.hbm [shape: f32[32,128], index: 1, kind: input, shape index: {}]   ;;  %s1093_s2 = inlined_call_operand.vmem [shape: f32[1,128], index: 2, kind: input, shape index: {}]   ;;  %s1094_s3 = inlined_call_operand.hbm [shape: f32[128,128], index: 3, kind: input, shape index: {}]   ;;  %s1095_s4 = inlined_call_operand.vmem [shape: f32[1,128], index: 4, kind: input, shape index: {}]   ;;  %s1096_s5 = inlined_call_operand.hbm [shape: f32[128,128], index: 5, kind: input, shape index: {}]   ;;  %s1097_s6 = inlined_call_operand.vmem [shape: f32[1,128], index: 6, kind: input, shape index: {}]   ;;  %s1098_s7 = inlined_call_operand.hbm [shape: f32[128,128], index: 7, kind: input, shape index: {}]   ;;  %s1099_s8 = inlined_call_operand.vmem [shape: f32[1,128], index: 8, kind: input, shape index: {}]   ;;  %s1100_s9 = inlined_call_operand.vmem [shape: f32[16,128], index: 9, kind: output, shape index: {}]  }
   0x1   :  { %15 = vsyncpa [#allocation5], 0 }
   0x2   :  { %16 = vsyncpa [#allocation8], 0  ;;  %s925_s30 = smov [#allocation4]   ;;  %s926_s11 = smov [#allocation7]  }
   0x3   :  { %s34_s10 = sshll.u32 %s925_s30, 4  ;;  %s62_s12 = sshll.u32 %s926_s11, 4  ;;  %s35_s10 = int_to_ptr.vmem [resolvable:$true] %s34_s10  ;;  %s982_s12 = int_to_ptr.vmem [resolvable:$true] %s62_s12 }
   0x4   :  { %s809_s15 = scalar_lea.hbm %s1092_s1, 512 }
   0x5   :  { %p810_p0 = scmp.ne.s32.totalorder %s1092_s1, %s809_s15  ;;  %p813_p1 = scmp.lt.u32.totalorder %s809_s15, %s1092_s1 }
   0x7   :  { %p815_p2 = pnand %p813_p1, %p810_p0 }
   0x9   :  { %818 = shalt.err (!%p815_p2)
}
   0xa   :  { %s819_s20 = scalar_lea.vmem %s35_s10, 512  ;;  %p824_p4 = scmp.lt.s32.totalorder %s35_s10, %s35_s10 }
   0xb   :  { %p820_p3 = scmp.ne.s32.totalorder %s35_s10, %s819_s20  ;;  %p825_p5 = scmp.lt.s32.totalorder %s819_s20, %s819_s20 }
   0xd   :  { %p826_p6 = por %p825_p5, %p824_p4 }
   0xf   :  { %p827_p7 = pnand %p826_p6, %p820_p3 }
  0x11   :  { %830 = shalt.err (!%p827_p7)
}
  0x12   :  { %s927_s21 = smov 128   ;;  %s928_s22 = smov 8  }
  0x13   :  { %40 = dma.hbm_to_vmem [thread:$0]  %s1092_s1, 512, %s35_s10, [#allocation5], %s927_s21, %s927_s21, %s928_s22  }
  0x14   :  { %s831_s27 = scalar_lea.hbm %s1096_s5, 2048 }
  0x15   :  { %p832_p8 = scmp.ne.s32.totalorder %s1096_s5, %s831_s27  ;;  %p835_p9 = scmp.lt.u32.totalorder %s831_s27, %s1096_s5 }
  0x17   :  { %p837_p10 = pnand %p835_p9, %p832_p8 }
  0x19   :  { %840 = shalt.err (!%p837_p10)
}
  0x1a   :  { %s841_s13 = scalar_lea.vmem %s982_s12, 2048  ;;  %p846_p12 = scmp.lt.s32.totalorder %s982_s12, %s982_s12 }
  0x1b   :  { %p842_p11 = scmp.ne.s32.totalorder %s982_s12, %s841_s13  ;;  %p847_p13 = scmp.lt.s32.totalorder %s841_s13, %s841_s13 }
  0x1d   :  { %p848_p0 = por %p847_p13, %p846_p12 }
  0x1f   :  { %p849_p1 = pnand %p848_p0, %p842_p11 }
  0x21   :  { %852 = shalt.err (!%p849_p1)
}
  0x22   :  { %68 = dma.hbm_to_vmem [thread:$0]  %s1096_s5, 2048, %s982_s12, [#allocation8], %s927_s21, %s927_s21, %s928_s22  }
  0x23   :  { %s929_s14 = smov [#allocation2]   ;;  %s930_s16 = smov [#allocation6]  }
  0x24   :  { %s22_s15 = sshll.u32 %s929_s14, 4  ;;  %s48_s17 = sshll.u32 %s930_s16, 4  ;;  %s23_s15 = int_to_ptr.vmem [resolvable:$true] %s22_s15  ;;  %s1019_s17 = int_to_ptr.vmem [resolvable:$true] %s48_s17 }
  0x25   :  { %s853_s20 = scalar_lea.hbm %s1091_s0, 256 }
  0x26   :  { %p854_p2 = scmp.ne.s32.totalorder %s1091_s0, %s853_s20  ;;  %p857_p3 = scmp.lt.u32.totalorder %s853_s20, %s1091_s0 }
  0x28   :  { %p859_p4 = pnand %p857_p3, %p854_p2 }
  0x2a   :  { %862 = shalt.err (!%p859_p4)
}
  0x2b   :  { %s863_s5 = scalar_lea.vmem %s23_s15, 256  ;;  %p868_p6 = scmp.lt.s32.totalorder %s23_s15, %s23_s15 }
  0x2c   :  { %p864_p5 = scmp.ne.s32.totalorder %s23_s15, %s863_s5  ;;  %p869_p7 = scmp.lt.s32.totalorder %s863_s5, %s863_s5 }
  0x2e   :  { %p870_p8 = por %p869_p7, %p868_p6 }
  0x30   :  { %p871_p9 = pnand %p870_p8, %p864_p5 }
  0x32   :  { %874 = shalt.err (!%p871_p9)
}
  0x33   :  { %28 = dma.hbm_to_vmem [thread:$0]  %s1091_s0, 256, %s23_s15, [#allocation3], %s927_s21, %s927_s21, %s928_s22  }
  0x34   :  { %s875_s30 = scalar_lea.hbm %s1094_s3, 2048 }
  0x35   :  { %p876_p10 = scmp.ne.s32.totalorder %s1094_s3, %s875_s30  ;;  %p879_p11 = scmp.lt.u32.totalorder %s875_s30, %s1094_s3 }
  0x37   :  { %p881_p12 = pnand %p879_p11, %p876_p10 }
  0x39   :  { %884 = shalt.err (!%p881_p12)
}
  0x3a   :  { %s885_s14 = scalar_lea.vmem %s1019_s17, 2048  ;;  %p890_p0 = scmp.lt.s32.totalorder %s1019_s17, %s1019_s17 }
  0x3b   :  { %p886_p13 = scmp.ne.s32.totalorder %s1019_s17, %s885_s14  ;;  %p891_p1 = scmp.lt.s32.totalorder %s885_s14, %s885_s14 }
  0x3d   :  { %p892_p2 = por %p891_p1, %p890_p0 }
  0x3f   :  { %p893_p3 = pnand %p892_p2, %p886_p13 }
  0x41   :  { %896 = shalt.err (!%p893_p3)
}
  0x42   :  { %54 = dma.hbm_to_vmem [thread:$0]  %s1094_s3, 2048, %s1019_s17, [#allocation5], %s927_s21, %s927_s21, %s928_s22  }
  0x43   :  { %s931_s16 = smov [#allocation9]   ;;  %s897_s23 = scalar_lea.hbm %s1098_s7, 2048 }
  0x44   :  { %s76_s18 = sshll.u32 %s931_s16, 4  ;;  %p898_p4 = scmp.ne.s32.totalorder %s1098_s7, %s897_s23  ;;  %s77_s18 = int_to_ptr.vmem [resolvable:$true] %s76_s18 }
  0x45   :  { %p901_p5 = scmp.lt.u32.totalorder %s897_s23, %s1098_s7 }
  0x47   :  { %p903_p6 = pnand %p901_p5, %p898_p4 }
  0x49   :  { %906 = shalt.err (!%p903_p6)
}
  0x4a   :  { %s907_s12 = scalar_lea.vmem %s77_s18, 2048  ;;  %p912_p8 = scmp.lt.s32.totalorder %s77_s18, %s77_s18 }
  0x4b   :  { %p908_p7 = scmp.ne.s32.totalorder %s77_s18, %s907_s12  ;;  %p913_p9 = scmp.lt.s32.totalorder %s907_s12, %s907_s12 }
  0x4d   :  { %p914_p10 = por %p913_p9, %p912_p8 }
  0x4f   :  { %p915_p11 = pnand %p914_p10, %p908_p7 }
  0x51   :  { %918 = shalt.err (!%p915_p11)
}
  0x52   :  { %82 = dma.hbm_to_vmem [thread:$0]  %s1098_s7, 2048, %s77_s18, [#allocation8], %s927_s21, %s927_s21, %s928_s22  }
  0x53   :  { %919 = dma.done.wait [#allocation3], 256  }
  0x54   :  { %920 = vsyncadd [#allocation3], 4294967040 }
  0x55   :  { %921 = dma.done.wait [#allocation5], 2560  }
  0x56   :  { %922 = vsyncadd [#allocation5], 4294964736 }
  0x57   :  { %923 = dma.done.wait [#allocation8], 4096  }
  0x58   :  { %924 = vsyncadd [#allocation8], 4294963200  ;;  %vm113_vm0 = vcmask 261120   ;;  %v102_v0 = vld [vmem:[#allocation4] sm:$0xff]  ;;  %v103_v1 = vld [vmem:[#allocation4 + $0x8] sm:$0xff] }
  0x59   :  { %v104_v2 = vld [vmem:[#allocation4 + $0x10] sm:$0xff]  ;;  %v686_v3 = vpack.c.bf16 %v103_v1, %v102_v0  ;;  %v105_v4 = vld [vmem:[#allocation4 + $0x18] sm:$0xff]  ;;  %v197_v7 = vld [vmem:[#allocation6] sm:$0xff] }
  0x5a   :  { %v100_v5 = vld [vmem:[#allocation2] sm:$0xff]  ;;  %v690_v6 = vpack.c.bf16 %v105_v4, %v104_v2  ;;  %v198_v8 = vld [vmem:[#allocation6 + $0x8] sm:$0xff]  ;;  %v200_v11 = vld [vmem:[#allocation6 + $0x18] sm:$0xff] }
  0x5b   :  { %578 = vmatprep.mubr.msk.f32.mxu0 %vm113_vm0, %v100_v5  ;;  %v199_v9 = vld [vmem:[#allocation6 + $0x10] sm:$0xff]  ;;  %687 = vmatprep.subr.bf16.mxu0 %v686_v3  ;;  %v694_v10 = vpack.c.bf16 %v198_v8, %v197_v7  ;;  %v201_v13 = vld [vmem:[#allocation6 + $0x20] sm:$0xff]  ;;  %v202_v14 = vld [vmem:[#allocation6 + $0x28] sm:$0xff] }
  0x5c   :  { %689 = vmatpush3.bf16.msra.mxu0 %v686_v3  ;;  %v698_v12 = vpack.c.bf16 %v200_v11, %v199_v9  ;;  %v702_v15 = vpack.c.bf16 %v202_v14, %v201_v13  ;;  %v101_v16 = vld [vmem:[#allocation2 + $0x8] sm:$0xff]  ;;  %v203_v17 = vld [vmem:[#allocation6 + $0x30] sm:$0xff]  ;;  %v205_v20 = vld [vmem:[#allocation6 + $0x40] sm:$0xff] }
  0x5d   :  { %691 = vmatprep.subr.bf16.mxu0 %v690_v6  ;;  %695 = vmatprep.subr.bf16.mxu1 %v694_v10  ;;  %v204_v18 = vld [vmem:[#allocation6 + $0x38] sm:$0xff]  ;;  %v206_v21 = vld [vmem:[#allocation6 + $0x48] sm:$0xff]  ;;  %v207_v23 = vld [vmem:[#allocation6 + $0x50] sm:$0xff] }
  0x5e   :  { %697 = vmatpush3.bf16.msra.mxu1 %v694_v10  ;;  %v706_v19 = vpack.c.bf16 %v204_v18, %v203_v17  ;;  %v710_v22 = vpack.c.bf16 %v206_v21, %v205_v20  ;;  %v208_v24 = vld [vmem:[#allocation6 + $0x58] sm:$0xff]  ;;  %v209_v26 = vld [vmem:[#allocation6 + $0x60] sm:$0xff]  ;;  %v210_v27 = vld [vmem:[#allocation6 + $0x68] sm:$0xff] }
  0x5f   :  { %699 = vmatprep.subr.bf16.mxu1 %v698_v12  ;;  %v714_v25 = vpack.c.bf16 %v208_v24, %v207_v23  ;;  %v211_v28 = vld [vmem:[#allocation6 + $0x70] sm:$0xff]  ;;  %v718_v29 = vpack.c.bf16 %v210_v27, %v209_v26  ;;  %v212_v30 = vld [vmem:[#allocation6 + $0x78] sm:$0xff]  ;;  %v297_v32 = vld [vmem:[#allocation7] sm:$0xff] }
  0x60   :  { %693 = vmatpush3.bf16.msra.mxu0 %v690_v6  ;;  %v722_v31 = vpack.c.bf16 %v212_v30, %v211_v28  ;;  %v298_v33 = vld [vmem:[#allocation7 + $0x8] sm:$0xff]  ;;  %v299_v34 = vld [vmem:[#allocation7 + $0x10] sm:$0xff]  ;;  %v300_v36 = vld [vmem:[#allocation7 + $0x18] sm:$0xff] }
  0x61   :  { %v726_v35 = vpack.c.bf16 %v298_v33, %v297_v32  ;;  %v730_v37 = vpack.c.bf16 %v300_v36, %v299_v34  ;;  %v301_v38 = vld [vmem:[#allocation7 + $0x20] sm:$0xff]  ;;  %v302_v39 = vld [vmem:[#allocation7 + $0x28] sm:$0xff]  ;;  %v303_v41 = vld [vmem:[#allocation7 + $0x30] sm:$0xff] }
  0x62   :  { %701 = vmatpush3.bf16.msra.mxu1 %v698_v12  ;;  %v734_v40 = vpack.c.bf16 %v302_v39, %v301_v38  ;;  %v304_v42 = vld [vmem:[#allocation7 + $0x38] sm:$0xff]  ;;  %v504_v44 = vld [vmem:[%s1093_s2] ss:$0 sm:$0xff]  ;;  %v306_v52 = vld [vmem:[#allocation7 + $0x48] sm:$0xff] }
  0x63   :  { %579 = vmatmul.mubr.msk.f32.vlgmr.msra.gmra.mrb[0].mxu0 %vm113_vm0, %v101_v16  ;;  %703 = vmatprep.subr.bf16.mxu1 %v702_v15  ;;  %v738_v43 = vpack.c.bf16 %v304_v42, %v303_v41  ;;  %v305_v51 = vld [vmem:[#allocation7 + $0x40] sm:$0xff]  ;;  %v307_v54 = vld [vmem:[#allocation7 + $0x50] sm:$0xff]  ;;  %v308_v55 = vld [vmem:[#allocation7 + $0x58] sm:$0xff] }
  0x64   :  { %727 = vmatprep.subr.bf16.mxu0 %v726_v35  ;;  %v742_v53 = vpack.c.bf16 %v306_v52, %v305_v51  ;;  %v746_v56 = vpack.c.bf16 %v308_v55, %v307_v54  ;;  %v309_v57 = vld [vmem:[#allocation7 + $0x60] sm:$0xff]  ;;  %v310_v58 = vld [vmem:[#allocation7 + $0x68] sm:$0xff]  ;;  %v311_v59 = vld [vmem:[#allocation7 + $0x70] sm:$0xff] }
  0x65   :  { %729 = vmatpush3.bf16.msra.mxu0 %v726_v35  ;;  %v750_v60 = vpack.c.bf16 %v310_v58, %v309_v57  ;;  %v312_v61 = vld [vmem:[#allocation7 + $0x78] sm:$0xff]  ;;  %v397_v63 = vld [vmem:[#allocation9] sm:$0xff]  ;;  %v398_v0 = vld [vmem:[#allocation9 + $0x8] sm:$0xff] }
  0x66   :  { %705 = vmatpush3.bf16.msra.mxu1 %v702_v15  ;;  %731 = vmatprep.subr.bf16.mxu0 %v730_v37  ;;  %v754_v62 = vpack.c.bf16 %v312_v61, %v311_v59  ;;  %v399_v1 = vld [vmem:[#allocation9 + $0x10] sm:$0xff]  ;;  %v758_v2 = vpack.c.bf16 %v398_v0, %v397_v63  ;;  %v400_v3 = vld [vmem:[#allocation9 + $0x18] sm:$0xff]  ;;  %v401_v5 = vld [vmem:[#allocation9 + $0x20] sm:$0xff] }
  0x67   :  { %707 = vmatprep.subr.bf16.mxu1 %v706_v19  ;;  %v762_v4 = vpack.c.bf16 %v400_v3, %v399_v1  ;;  %v402_v6 = vld [vmem:[#allocation9 + $0x28] sm:$0xff]  ;;  %v403_v8 = vld [vmem:[#allocation9 + $0x30] sm:$0xff]  ;;  %v404_v9 = vld [vmem:[#allocation9 + $0x38] sm:$0xff] }
  0x68   :  { %v766_v7 = vpack.c.bf16 %v402_v6, %v401_v5  ;;  %v770_v10 = vpack.c.bf16 %v404_v9, %v403_v8  ;;  %v507_v11 = vld [vmem:[%s1095_s4] ss:$0 sm:$0xff]  ;;  %v407_v21 = vld [vmem:[#allocation9 + $0x50] sm:$0xff]  ;;  %v412_v28 = vld [vmem:[#allocation9 + $0x78] sm:$0xff] }
  0x69   :  { %733 = vmatpush3.bf16.msra.mxu0 %v730_v37  ;;  %v405_v18 = vld [vmem:[#allocation9 + $0x40] sm:$0xff]  ;;  %v411_v26 = vld [vmem:[#allocation9 + $0x70] sm:$0xff] }
  0x6a   :  { %709 = vmatpush3.bf16.msra.mxu1 %v706_v19  ;;  %735 = vmatprep.subr.bf16.mxu0 %v734_v40  ;;  %v406_v19 = vld [vmem:[#allocation9 + $0x48] sm:$0xff]  ;;  %v409_v24 = vld [vmem:[#allocation9 + $0x60] sm:$0xff] }
  0x6b   :  { %711 = vmatprep.subr.bf16.mxu1 %v710_v22  ;;  %v774_v20 = vpack.c.bf16 %v406_v19, %v405_v18  ;;  %v508_v30 = vld [vmem:[%s1097_s6] ss:$0 sm:$0xff] }
  0x6c   :  { %v509_v37 = vld [vmem:[%s1099_s8] ss:$0 sm:$0xff] }
  0x6d   :  { %737 = vmatpush3.bf16.msra.mxu0 %v734_v40 }
  0x6e   :  { %713 = vmatpush3.bf16.msra.mxu1 %v710_v22  ;;  %739 = vmatprep.subr.bf16.mxu0 %v738_v43  ;;  %v408_v22 = vld [vmem:[#allocation9 + $0x58] sm:$0xff] }
  0x6f   :  { %715 = vmatprep.subr.bf16.mxu1 %v714_v25  ;;  %v778_v23 = vpack.c.bf16 %v408_v22, %v407_v21 }
  0x71   :  { %741 = vmatpush3.bf16.msra.mxu0 %v738_v43 }
  0x72   :  { %717 = vmatpush3.bf16.msra.mxu1 %v714_v25  ;;  %743 = vmatprep.subr.bf16.mxu0 %v742_v53  ;;  %v410_v25 = vld [vmem:[#allocation9 + $0x68] sm:$0xff] }
  0x73   :  { %719 = vmatprep.subr.bf16.mxu1 %v718_v29  ;;  %v782_v27 = vpack.c.bf16 %v410_v25, %v409_v24 }
  0x75   :  { %745 = vmatpush3.bf16.msra.mxu0 %v742_v53 }
  0x76   :  { %721 = vmatpush3.bf16.msra.mxu1 %v718_v29  ;;  %747 = vmatprep.subr.bf16.mxu0 %v746_v56  ;;  %v786_v29 = vpack.c.bf16 %v412_v28, %v411_v26 }
  0x77   :  { %723 = vmatprep.subr.bf16.mxu1 %v722_v31 }
  0x79   :  { %749 = vmatpush3.bf16.msra.mxu0 %v746_v56 }
  0x7a   :  { %725 = vmatpush3.bf16.msra.mxu1 %v722_v31  ;;  %751 = vmatprep.subr.bf16.mxu0 %v750_v60 }
  0x7b   :  { %759 = vmatprep.subr.bf16.mxu1 %v758_v2 }
  0x7d   :  { %753 = vmatpush3.bf16.msra.mxu0 %v750_v60 }
  0x7e   :  { %755 = vmatprep.subr.bf16.mxu0 %v754_v62 }
  0x81   :  { %757 = vmatpush3.bf16.msra.mxu0 %v754_v62 }
 0x136   :  { %v580_v45 = vpop.f32.mrb[0].mxu0 }
 0x137   :  { %v192_v46 = vadd.f32 %v580_v45, %v504_v44  ;;  %v186_v47 = vpop.f32.mrb[1].mxu0 }
 0x138   :  { %v187_v48 = vadd.f32 %v504_v44, %v186_v47 }
 0x13a   :  { %797 = vtanh.f32 %v187_v48 }
 0x13b   :  { %799 = vtanh.f32 %v192_v46 }
 0x144   :  { %v798_v49 = vpop.eup %797 }
 0x145   :  { %v800_v50 = vpop.eup %799  ;;  %613 = vmatprep.mubr.f32.mxu1 %v798_v49 }
 0x146   :  { %614 = vmatmul.mubr.f32.vlgmr.msra.gmra.mrb[0].mxu1 %v800_v50 }
 0x147   :  { %761 = vmatpush3.bf16.msra.mxu1 %v758_v2 }
 0x148   :  { %763 = vmatprep.subr.bf16.mxu1 %v762_v4 }
 0x14b   :  { %765 = vmatpush3.bf16.msra.mxu1 %v762_v4 }
 0x14c   :  { %767 = vmatprep.subr.bf16.mxu1 %v766_v7 }
 0x14f   :  { %769 = vmatpush3.bf16.msra.mxu1 %v766_v7 }
 0x150   :  { %771 = vmatprep.subr.bf16.mxu1 %v770_v10 }
 0x153   :  { %773 = vmatpush3.bf16.msra.mxu1 %v770_v10 }
 0x154   :  { %775 = vmatprep.subr.bf16.mxu1 %v774_v20 }
 0x157   :  { %777 = vmatpush3.bf16.msra.mxu1 %v774_v20 }
 0x158   :  { %779 = vmatprep.subr.bf16.mxu1 %v778_v23 }
 0x15b   :  { %781 = vmatpush3.bf16.msra.mxu1 %v778_v23 }
 0x15c   :  { %783 = vmatprep.subr.bf16.mxu1 %v782_v27 }
 0x15f   :  { %785 = vmatpush3.bf16.msra.mxu1 %v782_v27 }
 0x160   :  { %787 = vmatprep.subr.bf16.mxu1 %v786_v29 }
 0x163   :  { %789 = vmatpush3.bf16.msra.mxu1 %v786_v29 }
 0x219   :  { %v615_v12 = vpop.f32.mrb[0].mxu1 }
 0x21a   :  { %v292_v13 = vadd.f32 %v615_v12, %v507_v11  ;;  %v286_v14 = vpop.f32.mrb[1].mxu1 }
 0x21b   :  { %v287_v15 = vadd.f32 %v507_v11, %v286_v14 }
 0x21d   :  { %801 = vtanh.f32 %v287_v15 }
 0x21e   :  { %803 = vtanh.f32 %v292_v13 }
 0x227   :  { %v802_v16 = vpop.eup %801 }
 0x228   :  { %v804_v17 = vpop.eup %803  ;;  %648 = vmatprep.mubr.f32.mxu0 %v802_v16 }
 0x229   :  { %649 = vmatmul.mubr.f32.vlgmr.msra.gmra.mrb[2].mxu0 %v804_v17 }
 0x2fc   :  { %v650_v31 = vpop.f32.mrb[2].mxu0 }
 0x2fd   :  { %v392_v32 = vadd.f32 %v650_v31, %v508_v30  ;;  %v386_v33 = vpop.f32.mrb[3].mxu0 }
 0x2fe   :  { %v387_v34 = vadd.f32 %v508_v30, %v386_v33 }
 0x300   :  { %805 = vtanh.f32 %v387_v34 }
 0x301   :  { %807 = vtanh.f32 %v392_v32 }
 0x30a   :  { %v806_v35 = vpop.eup %805 }
 0x30b   :  { %v808_v36 = vpop.eup %807  ;;  %683 = vmatprep.mubr.f32.mxu1 %v806_v35 }
 0x30c   :  { %684 = vmatmul.mubr.f32.vlgmr.msra.gmra.mrb[2].mxu1 %v808_v36 }
 0x3df   :  { %v685_v38 = vpop.f32.mrb[2].mxu1 }
 0x3e0   :  { %v492_v39 = vadd.f32 %v685_v38, %v509_v37  ;;  %v486_v40 = vpop.f32.mrb[3].mxu1 }
 0x3e1   :  { %v487_v41 = vadd.f32 %v509_v37, %v486_v40 }
 0x3e2   :  { %496 = vst [vmem:[%s1100_s9 + $0x8] sm:$0xff] %v492_v39 }
 0x3e3   :  { %495 = vst [vmem:[%s1100_s9] sm:$0xff] %v487_v41 }
 0x3e4   :  { %501 = vsyncpa [#allocation3], 1 }
 0x3e5   :  { %502 = vsyncpa [#allocation5], 1 }
 0x3e6   :  { %503 = vsyncpa [#allocation8], 1 }

</bundles_post_ra>
